<compile_context>
chip_gen: v5e
topology: v5e:2x2
jax: 0.10.0
libtpu: 0.0.40
codegen_flags: <defaults>
</compile_context>

<pallas_src>
import functools
import math

import jax
import jax.numpy as jnp
from jax.experimental import pallas as pl
from jax.experimental.pallas import tpu as pltpu

LANE = 128                     # last-dim (lane) alignment
VMEM_WS_BUDGET = 24 << 20      # target VMEM working set (v7x-safe)


def _round_up(n, m):
    return ((n + m - 1) // m) * m


def _pick_tile_b(batch, weight_bytes, act_bytes_per_row, budget_bytes):
    """Largest batch tile (multiple of 8, <= batch) whose working set fits the budget."""
    candidates = [t for t in (1024, 512, 256, 128, 64, 32, 16, 8) if t <= batch]
    if not candidates:
        return batch                       # tiny batch: one block == full batch dim
    for t in candidates:
        if weight_bytes + t * act_bytes_per_row <= budget_bytes:
            return t
    return candidates[-1]                  # best effort (8)


def _fused_mlp_kernel(*refs, num_layers, emit_all):
    """refs = (x, w0, b0, ..., w{L-1}, b{L-1}, o0, o1, ... | o_last).

    Statically-unrolled Linear chain. Activations stay in vregs/VMEM between
    layers; bf16 operands feed the MXU, accumulation and bias add are f32.
    """
    x_ref = refs[0]
    w_refs = refs[1:1 + 2 * num_layers:2]
    b_refs = refs[2:1 + 2 * num_layers:2]
    o_refs = refs[1 + 2 * num_layers:]

    h = x_ref[...]                                       # (TILE_B, in_p) bf16
    for l in range(num_layers):                          # statically unrolled
        acc = jnp.dot(h, w_refs[l][...], preferred_element_type=jnp.float32)
        acc = acc + b_refs[l][...]                       # f32 bias broadcast over batch
        h = acc.astype(jnp.bfloat16)
        if emit_all:
            o_refs[l][...] = h
    if not emit_all:
        o_refs[0][...] = h


def fused_mlp(x_pad, padded_params, *, keep_trace):
    """x_pad: (B, in_p) bf16; padded_params: [(W_t_pad bf16, b_pad f32), ...].

    Returns padded bf16 activations: one per layer if keep_trace else just the last.
    """
    num_layers = len(padded_params)
    B, in_p = x_pad.shape
    out_pads = [w.shape[1] for w, _ in padded_params]
    emit_pads = out_pads if keep_trace else out_pads[-1:]

    # VMEM working-set estimate (pipeline double-buffers each operand; weights are
    # fetched only once thanks to the constant index_map but still get 2 buffers).
    weight_bytes = 2 * sum(int(w.size) * w.dtype.itemsize + int(b.size) * b.dtype.itemsize
                           for w, b in padded_params)
    act_bytes_per_row = 2 * 2 * (in_p + sum(emit_pads))       # bf16, double-buffered
    tile_b = _pick_tile_b(B, weight_bytes, act_bytes_per_row, VMEM_WS_BUDGET)
    grid = (pl.cdiv(B, tile_b),)

    vmem_limit = int(min(max(weight_bytes + tile_b * act_bytes_per_row + (4 << 20),
                             32 << 20),
                         100 << 20))

    vmem = pltpu.MemorySpace.VMEM
    flat_inputs = [x_pad]
    in_specs = [pl.BlockSpec((tile_b, in_p), lambda i: (i, 0), memory_space=vmem)]
    for w_pad, b_pad in padded_params:
        flat_inputs += [w_pad, b_pad]
        in_specs += [
            pl.BlockSpec(w_pad.shape, lambda i: (0, 0), memory_space=vmem),
            pl.BlockSpec(b_pad.shape, lambda i: (0, 0), memory_space=vmem),
        ]

    out_shapes = tuple(jax.ShapeDtypeStruct((B, p), jnp.bfloat16) for p in emit_pads)
    out_specs = tuple(pl.BlockSpec((tile_b, p), lambda i: (i, 0), memory_space=vmem)
                      for p in emit_pads)

    kernel = functools.partial(_fused_mlp_kernel, num_layers=num_layers,
                               emit_all=keep_trace)
    return pl.pallas_call(
        kernel,
        grid=grid,
        out_shape=out_shapes,
        in_specs=in_specs,
        out_specs=out_specs,
        compiler_params=pltpu.CompilerParams(
            dimension_semantics=("parallel",),   # batch tiles independent → 2 TCs on v7x
            vmem_limit_bytes=vmem_limit,
        ),
    )(*flat_inputs)


class MyModulePallas:
    """Mirror of the PyTorch MyModule: a chain of Linear layers, keeping a trace."""

    def __init__(self, sizes, key, keep_trace=True):
        self.sizes = list(sizes)
        self.num_layers = len(sizes) - 1
        self.keep_trace = keep_trace
        self.params = []          # unpadded f32 (W^T, bias) — reference semantics
        self.padded_params = []   # lane-padded bf16 W^T / f32 bias fed to the kernel

        for in_f, out_f in zip(sizes, sizes[1:]):
            key, wk, bk = jax.random.split(key, 3)
            bound = 1.0 / math.sqrt(in_f)        # torch.nn.Linear default init
            w = jax.random.uniform(wk, (out_f, in_f), jnp.float32, -bound, bound)
            b = jax.random.uniform(bk, (out_f,), jnp.float32, -bound, bound)
            w_t = w.T                             # (in_f, out_f): y = x @ W^T + b
            self.params.append((w_t, b.reshape(1, out_f)))

            in_p = _round_up(in_f, LANE)
            out_p = _round_up(out_f, LANE)
            w_pad = jnp.zeros((in_p, out_p), jnp.bfloat16)
            w_pad = w_pad.at[:in_f, :out_f].set(w_t.astype(jnp.bfloat16))
            b_pad = jnp.zeros((1, out_p), jnp.float32).at[:, :out_f].set(b)
            self.padded_params.append((w_pad, b_pad))

        self.in_pad = _round_up(sizes[0], LANE)
        self.trace = []
        self._forward = jax.jit(self._forward_impl)

    def _forward_impl(self, x, padded_params):
        """Pure function: x, params -> tuple of (trace or final-only) activations."""
        B, in_f = x.shape
        xb = x.astype(jnp.bfloat16)
        if self.in_pad != in_f:
            # Lane-pad features as part of the bf16 cast; batch stays unpadded
            # (ragged batch tiles are handled by the cdiv grid).
            xp = jnp.zeros((B, self.in_pad), jnp.bfloat16).at[:, :in_f].set(xb)
        else:
            xp = xb
        outs_pad = fused_mlp(xp, padded_params, keep_trace=self.keep_trace)
        out_feats = self.sizes[1:] if self.keep_trace else self.sizes[-1:]
        return tuple(o[:, :f] for o, f in zip(outs_pad, out_feats))

    def __call__(self, x):
        outs = self._forward(x, self.padded_params)
        if self.keep_trace:
            self.trace.extend(outs)     # mirror PyTorch: record every activation
        return outs[-1]


if __name__ == "__main__":
    key = jax.random.PRNGKey(0)
    sizes = [32, 64, 48, 16]            # -> Linear(32,64), Linear(64,48), Linear(48,16)
    batch = 8

    key, xk, pk = jax.random.split(key, 3)
    x = jax.random.normal(xk, (batch, sizes[0]), jnp.float32)

    model = MyModulePallas(sizes, pk, keep_trace=True)
    y = model(x)
    jax.block_until_ready(y)

    # f32 reference (same semantics as the torch module); bf16 kernel → relaxed tol.
    ref = x
    ref_trace = []
    for w_t, b in model.params:
        ref = ref @ w_t + b
        ref_trace.append(ref)

    assert y.shape == (batch, sizes[-1])
    assert jnp.allclose(y.astype(jnp.float32), ref, atol=5e-2, rtol=5e-2)
    assert len(model.trace) == len(ref_trace)
    for got, want in zip(model.trace, ref_trace):
        assert got.shape == want.shape
        assert jnp.allclose(got.astype(jnp.float32), want, atol=5e-2, rtol=5e-2)

    # keep_trace=False path: only the final activation is written back to HBM.
    model_nt = MyModulePallas(sizes, pk, keep_trace=False)
    y_nt = model_nt(x)
    jax.block_until_ready(y_nt)
    assert len(model_nt.trace) == 0
    assert jnp.allclose(y_nt.astype(jnp.float32), y.astype(jnp.float32),
                        atol=1e-3, rtol=1e-3)

    # Ragged batch (not a multiple of the batch tile): grid masks the partial tile.
    x13 = jax.random.normal(jax.random.PRNGKey(1), (13, sizes[0]), jnp.float32)
    y13 = model_nt(x13)
    jax.block_until_ready(y13)
    ref13 = x13
    for w_t, b in model_nt.params:
        ref13 = ref13 @ w_t + b
    assert y13.shape == (13, sizes[-1])
    assert jnp.allclose(y13.astype(jnp.float32), ref13, atol=5e-2, rtol=5e-2)

    print("KERNEL_OK")
</pallas_src>

<mosaic_0001>
module attributes {stable_mosaic.version = 11 : i64} {
  func.func @_fused_mlp_kernel(%arg0: i32, %arg1: memref<8x128xbf16, #tpu.memory_space<vmem>>, %arg2: memref<128x128xbf16, #tpu.memory_space<vmem>>, %arg3: memref<1x128xf32, #tpu.memory_space<vmem>>, %arg4: memref<128x128xbf16, #tpu.memory_space<vmem>>, %arg5: memref<1x128xf32, #tpu.memory_space<vmem>>, %arg6: memref<128x128xbf16, #tpu.memory_space<vmem>>, %arg7: memref<1x128xf32, #tpu.memory_space<vmem>>, %arg8: memref<8x128xbf16, #tpu.memory_space<vmem>>, %arg9: memref<8x128xbf16, #tpu.memory_space<vmem>>, %arg10: memref<8x128xbf16, #tpu.memory_space<vmem>>) attributes {dimension_semantics = [#tpu.dimension_semantics<parallel>], iteration_bounds = array<i64: 1>, scalar_prefetch = 0 : i64, scratch_operands = 0 : i64, tpu.core_type = #tpu.core_type<tc>, window_params = [{transform_indices = @transform_0, window_bounds = array<i64: 8, 128>}, {pipeline_mode = #tpu.pipeline_mode<synchronous>, transform_indices = @transform_1, window_bounds = array<i64: 128, 128>}, {pipeline_mode = #tpu.pipeline_mode<synchronous>, transform_indices = @transform_2, window_bounds = array<i64: 1, 128>}, {pipeline_mode = #tpu.pipeline_mode<synchronous>, transform_indices = @transform_3, window_bounds = array<i64: 128, 128>}, {pipeline_mode = #tpu.pipeline_mode<synchronous>, transform_indices = @transform_4, window_bounds = array<i64: 1, 128>}, {pipeline_mode = #tpu.pipeline_mode<synchronous>, transform_indices = @transform_5, window_bounds = array<i64: 128, 128>}, {pipeline_mode = #tpu.pipeline_mode<synchronous>, transform_indices = @transform_6, window_bounds = array<i64: 1, 128>}, {transform_indices = @transform_7, window_bounds = array<i64: 8, 128>}, {transform_indices = @transform_8, window_bounds = array<i64: 8, 128>}, {transform_indices = @transform_9, window_bounds = array<i64: 8, 128>}]} {
    %c0 = arith.constant 0 : index
    %c0_0 = arith.constant 0 : index
    %0 = vector.load %arg1[%c0, %c0_0] : memref<8x128xbf16, #tpu.memory_space<vmem>>, vector<8x128xbf16>
    %c0_1 = arith.constant 0 : index
    %c0_2 = arith.constant 0 : index
    %1 = vector.load %arg2[%c0_1, %c0_2] : memref<128x128xbf16, #tpu.memory_space<vmem>>, vector<128x128xbf16>
    %cst = arith.constant dense<0.000000e+00> : vector<8x128xf32>
    %2 = tpu.matmul %0, %1, %cst {dimension_numbers = #tpu.dot_dimension_numbers<[1], [0], [0], [1], [0, 0, 1, 1], [], []>} : vector<8x128xbf16>, vector<128x128xbf16>, vector<8x128xf32> -> vector<8x128xf32>
    %c0_3 = arith.constant 0 : index
    %c0_4 = arith.constant 0 : index
    %3 = vector.load %arg3[%c0_3, %c0_4] : memref<1x128xf32, #tpu.memory_space<vmem>>, vector<1x128xf32>
    %4 = vector.broadcast %3 : vector<1x128xf32> to vector<8x128xf32>
    %5 = arith.addf %2, %4 : vector<8x128xf32>
    %6 = arith.truncf %5 : vector<8x128xf32> to vector<8x128xbf16>
    %c0_5 = arith.constant 0 : index
    %c0_6 = arith.constant 0 : index
    %7 = vector.load %arg8[%c0_5, %c0_6] : memref<8x128xbf16, #tpu.memory_space<vmem>>, vector<8x128xbf16>
    tpu.vector_store %arg8[%c0_5, %c0_6], %6 {strides = array<i32>} : memref<8x128xbf16, #tpu.memory_space<vmem>>, vector<8x128xbf16>,
    %c0_7 = arith.constant 0 : index
    %c0_8 = arith.constant 0 : index
    %8 = vector.load %arg4[%c0_7, %c0_8] : memref<128x128xbf16, #tpu.memory_space<vmem>>, vector<128x128xbf16>
    %cst_9 = arith.constant dense<0.000000e+00> : vector<8x128xf32>
    %9 = tpu.matmul %6, %8, %cst_9 {dimension_numbers = #tpu.dot_dimension_numbers<[1], [0], [0], [1], [0, 0, 1, 1], [], []>} : vector<8x128xbf16>, vector<128x128xbf16>, vector<8x128xf32> -> vector<8x128xf32>
    %c0_10 = arith.constant 0 : index
    %c0_11 = arith.constant 0 : index
    %10 = vector.load %arg5[%c0_10, %c0_11] : memref<1x128xf32, #tpu.memory_space<vmem>>, vector<1x128xf32>
    %11 = vector.broadcast %10 : vector<1x128xf32> to vector<8x128xf32>
    %12 = arith.addf %9, %11 : vector<8x128xf32>
    %13 = arith.truncf %12 : vector<8x128xf32> to vector<8x128xbf16>
    %c0_12 = arith.constant 0 : index
    %c0_13 = arith.constant 0 : index
    %14 = vector.load %arg9[%c0_12, %c0_13] : memref<8x128xbf16, #tpu.memory_space<vmem>>, vector<8x128xbf16>
    tpu.vector_store %arg9[%c0_12, %c0_13], %13 {strides = array<i32>} : memref<8x128xbf16, #tpu.memory_space<vmem>>, vector<8x128xbf16>,
    %c0_14 = arith.constant 0 : index
    %c0_15 = arith.constant 0 : index
    %15 = vector.load %arg6[%c0_14, %c0_15] : memref<128x128xbf16, #tpu.memory_space<vmem>>, vector<128x128xbf16>
    %cst_16 = arith.constant dense<0.000000e+00> : vector<8x128xf32>
    %16 = tpu.matmul %13, %15, %cst_16 {dimension_numbers = #tpu.dot_dimension_numbers<[1], [0], [0], [1], [0, 0, 1, 1], [], []>} : vector<8x128xbf16>, vector<128x128xbf16>, vector<8x128xf32> -> vector<8x128xf32>
    %c0_17 = arith.constant 0 : index
    %c0_18 = arith.constant 0 : index
    %17 = vector.load %arg7[%c0_17, %c0_18] : memref<1x128xf32, #tpu.memory_space<vmem>>, vector<1x128xf32>
    %18 = vector.broadcast %17 : vector<1x128xf32> to vector<8x128xf32>
    %19 = arith.addf %16, %18 : vector<8x128xf32>
    %20 = arith.truncf %19 : vector<8x128xf32> to vector<8x128xbf16>
    %c0_19 = arith.constant 0 : index
    %c0_20 = arith.constant 0 : index
    %21 = vector.load %arg10[%c0_19, %c0_20] : memref<8x128xbf16, #tpu.memory_space<vmem>>, vector<8x128xbf16>
    tpu.vector_store %arg10[%c0_19, %c0_20], %20 {strides = array<i32>} : memref<8x128xbf16, #tpu.memory_space<vmem>>, vector<8x128xbf16>,
    return
  }
  func.func @transform_0(%arg0: i32) -> (i32, i32) {
    %c0_i32 = arith.constant 0 : i32
    %c0_i32_0 = arith.constant 0 : i32
    return %arg0, %c0_i32 : i32, i32
  }
  func.func @transform_1(%arg0: i32) -> (i32, i32) {
    %c0_i32 = arith.constant 0 : i32
    %c0_i32_0 = arith.constant 0 : i32
    %c0_i32_1 = arith.constant 0 : i32
    return %c0_i32, %c0_i32_0 : i32, i32
  }
  func.func @transform_2(%arg0: i32) -> (i32, i32) {
    %c0_i32 = arith.constant 0 : i32
    %c0_i32_0 = arith.constant 0 : i32
    %c0_i32_1 = arith.constant 0 : i32
    return %c0_i32, %c0_i32_0 : i32, i32
  }
  func.func @transform_3(%arg0: i32) -> (i32, i32) {
    %c0_i32 = arith.constant 0 : i32
    %c0_i32_0 = arith.constant 0 : i32
    %c0_i32_1 = arith.constant 0 : i32
    return %c0_i32, %c0_i32_0 : i32, i32
  }
  func.func @transform_4(%arg0: i32) -> (i32, i32) {
    %c0_i32 = arith.constant 0 : i32
    %c0_i32_0 = arith.constant 0 : i32
    %c0_i32_1 = arith.constant 0 : i32
    return %c0_i32, %c0_i32_0 : i32, i32
  }
  func.func @transform_5(%arg0: i32) -> (i32, i32) {
    %c0_i32 = arith.constant 0 : i32
    %c0_i32_0 = arith.constant 0 : i32
    %c0_i32_1 = arith.constant 0 : i32
    return %c0_i32, %c0_i32_0 : i32, i32
  }
  func.func @transform_6(%arg0: i32) -> (i32, i32) {
    %c0_i32 = arith.constant 0 : i32
    %c0_i32_0 = arith.constant 0 : i32
    %c0_i32_1 = arith.constant 0 : i32
    return %c0_i32, %c0_i32_0 : i32, i32
  }
  func.func @transform_7(%arg0: i32) -> (i32, i32) {
    %c0_i32 = arith.constant 0 : i32
    %c0_i32_0 = arith.constant 0 : i32
    return %arg0, %c0_i32 : i32, i32
  }
  func.func @transform_8(%arg0: i32) -> (i32, i32) {
    %c0_i32 = arith.constant 0 : i32
    %c0_i32_0 = arith.constant 0 : i32
    return %arg0, %c0_i32 : i32, i32
  }
  func.func @transform_9(%arg0: i32) -> (i32, i32) {
    %c0_i32 = arith.constant 0 : i32
    %c0_i32_0 = arith.constant 0 : i32
    return %arg0, %c0_i32 : i32, i32
  }
}

</mosaic_0001>

<bundles_post_ra>
// kernel: _forward_impl.1
= control target key start
LH: loop header
LB: loop body
LE: loop exit
PB: predicated region body
PF: predicated region fallthrough
CT: control target
= control target key end

     0   :  { %15 = vsyncpa [#allocation3], 0  ;;  %s748_s0 = inlined_call_operand.vmem [shape: bf16[8,128], index: 0, kind: input, shape index: {}]   ;;  %s749_s1 = inlined_call_operand.hbm [shape: bf16[128,128], index: 1, kind: input, shape index: {}]   ;;  %s750_s2 = inlined_call_operand.vmem [shape: f32[1,128], index: 2, kind: input, shape index: {}]   ;;  %s751_s3 = inlined_call_operand.hbm [shape: bf16[128,128], index: 3, kind: input, shape index: {}]   ;;  %s752_s4 = inlined_call_operand.vmem [shape: f32[1,128], index: 4, kind: input, shape index: {}]   ;;  %s753_s5 = inlined_call_operand.hbm [shape: bf16[128,128], index: 5, kind: input, shape index: {}]   ;;  %s754_s6 = inlined_call_operand.vmem [shape: f32[1,128], index: 6, kind: input, shape index: {}]   ;;  %s755_s7 = inlined_call_operand.hbm [shape: bf16[8,128], index: 7, kind: output, shape index: {0}]   ;;  %s756_s8 = inlined_call_operand.hbm [shape: bf16[8,128], index: 8, kind: output, shape index: {1}]   ;;  %s757_s9 = inlined_call_operand.hbm [shape: bf16[8,128], index: 9, kind: output, shape index: {2}]  }
   0x1   :  { %16 = vsyncpa [#allocation6], 0 }
   0x2   :  { %17 = vsyncpa [#allocation4], 0 }
   0x3   :  { %18 = vsyncpa [#allocation10], 0  ;;  %s40_s11 = sshll.u32 %s751_s3, 4  ;;  %s660_s12 = smov [#allocation5]   ;;  %s41_s11 = int_to_ptr.hbm [resolvable:$true] %s40_s11 }
   0x4   :  { %s42_s13 = sshll.u32 %s660_s12, 4  ;;  %s25_s16 = sshll.u32 %s749_s1, 4  ;;  %s43_s13 = int_to_ptr.vmem [resolvable:$true] %s42_s13  ;;  %s26_s16 = int_to_ptr.hbm [resolvable:$true] %s25_s16 }
   0x5   :  { %s661_s17 = smov 64   ;;  %s662_s18 = smov 4  }
   0x6   :  { %48 = dma.hbm_to_vmem [thread:$0]  %s41_s11, 1024, %s43_s13, [#allocation6], %s661_s17, %s661_s17, %s662_s18  }
   0x7   :  { %s663_s19 = smov [#allocation2]   ;;  %s55_s23 = sshll.u32 %s753_s5, 4  ;;  %s56_s23 = int_to_ptr.hbm [resolvable:$true] %s55_s23 }
   0x8   :  { %s27_s20 = sshll.u32 %s663_s19, 4  ;;  %s664_s3 = smov [#allocation7]   ;;  %s28_s20 = int_to_ptr.vmem [resolvable:$true] %s27_s20 }
   0x9   :  { %33 = dma.hbm_to_vmem [thread:$0]  %s26_s16, 1024, %s28_s20, [#allocation3], %s661_s17, %s661_s17, %s662_s18  }
   0xa   :  { %s57_s24 = sshll.u32 %s664_s3, 4  ;;  %s58_s24 = int_to_ptr.vmem [resolvable:$true] %s57_s24 }
   0xb   :  { %63 = dma.hbm_to_vmem [thread:$0]  %s56_s23, 1024, %s58_s24, [#allocation6], %s661_s17, %s661_s17, %s662_s18  }
   0xc   :  { %652 = dma.done.wait [#allocation3], 1024  }
   0xd   :  { %653 = vsyncadd [#allocation3], 4294966272 }
   0xe   :  { %654 = dma.done.wait [#allocation6], 2048  }
   0xf   :  { %655 = vsyncadd [#allocation6], 4294965248  ;;  %v480_v0 = vld [vmem:[#allocation2 + $0x38] sm:$0xff]  ;;  %v479_v1 = vld [vmem:[#allocation2 + $0x30] sm:$0xff]  ;;  %s346_s10 = sshll.u32 %s756_s8, 4  ;;  %s335_s13 = sshll.u32 %s755_s7, 4  ;;  %s347_s10 = int_to_ptr.hbm [resolvable:$true] %s346_s10  ;;  %s336_s13 = int_to_ptr.hbm [resolvable:$true] %s335_s13 }
  0x10   :  { %147 = vmatpush.bf16.msra.mxu0 %v480_v0  ;;  %v488_v2 = vld [vmem:[#allocation5 + $0x38] sm:$0xff]  ;;  %v487_v3 = vld [vmem:[#allocation5 + $0x30] sm:$0xff]  ;;  %v478_v4 = vld [vmem:[#allocation2 + $0x28] sm:$0xff]  ;;  %s667_s17 = smov [#allocation11]   ;;  %s357_s20 = sshll.u32 %s757_s9, 4  ;;  %s358_s20 = int_to_ptr.hbm [resolvable:$true] %s357_s20 }
  0x11   :  { %230 = vmatpush.bf16.msra.mxu1 %v488_v2  ;;  %v486_v5 = vld [vmem:[#allocation5 + $0x28] sm:$0xff]  ;;  %v477_v6 = vld [vmem:[#allocation2 + $0x20] sm:$0xff]  ;;  %v476_v8 = vld [vmem:[#allocation2 + $0x18] sm:$0xff]  ;;  %s355_s18 = sshll.u32 %s667_s17, 4  ;;  %s356_s18 = int_to_ptr.vmem [resolvable:$true] %s355_s18 }
  0x12   :  { %v485_v7 = vld [vmem:[#allocation5 + $0x20] sm:$0xff]  ;;  %v484_v9 = vld [vmem:[#allocation5 + $0x18] sm:$0xff]  ;;  %v475_v10 = vld [vmem:[#allocation2 + $0x10] sm:$0xff] }
  0x13   :  { %v483_v11 = vld [vmem:[#allocation5 + $0x10] sm:$0xff]  ;;  %v474_v12 = vld [vmem:[#allocation2 + $0x8] sm:$0xff]  ;;  %v473_v14 = vld [vmem:[#allocation2] sm:$0xff] }
  0x14   :  { %148 = vmatpush.bf16.msra.mxu0 %v479_v1  ;;  %v482_v13 = vld [vmem:[#allocation5 + $0x8] sm:$0xff]  ;;  %v78_v15 = vld [vmem:[%s748_s0] sm:$0xf]  ;;  %v496_v17 = vld [vmem:[#allocation7 + $0x38] sm:$0xff] }
  0x15   :  { %231 = vmatpush.bf16.msra.mxu1 %v487_v3  ;;  %v481_v16 = vld [vmem:[#allocation5] sm:$0xff]  ;;  %313 = vmatpush.bf16.msra.mxu2 %v496_v17  ;;  %v495_v18 = vld [vmem:[#allocation7 + $0x30] sm:$0xff]  ;;  %v494_v19 = vld [vmem:[#allocation7 + $0x28] sm:$0xff] }
  0x16   :  { %v493_v20 = vld [vmem:[#allocation7 + $0x20] sm:$0xff]  ;;  %v492_v21 = vld [vmem:[#allocation7 + $0x18] sm:$0xff]  ;;  %v491_v22 = vld [vmem:[#allocation7 + $0x10] sm:$0xff] }
  0x17   :  { %v505_v23 = vld [vmem:[%s750_s2] ss:$0 sm:$0xff]  ;;  %v490_v24 = vld [vmem:[#allocation7 + $0x8] sm:$0xff]  ;;  %s665_s2 = smov [#allocation9]  }
  0x18   :  { %149 = vmatpush.bf16.msra.mxu0 %v478_v4  ;;  %v489_v29 = vld [vmem:[#allocation7] sm:$0xff]  ;;  %s344_s28 = sshll.u32 %s665_s2, 4  ;;  %s345_s28 = int_to_ptr.vmem [resolvable:$true] %s344_s28 }
  0x19   :  { %232 = vmatpush.bf16.msra.mxu1 %v486_v5  ;;  %314 = vmatpush.bf16.msra.mxu2 %v495_v18  ;;  %v506_v30 = vld [vmem:[%s752_s4] ss:$0 sm:$0xff]  ;;  %s666_s4 = smov [#allocation8]  }
  0x1a   :  { %s333_s14 = sshll.u32 %s666_s4, 4  ;;  %v507_v35 = vld [vmem:[%s754_s6] ss:$0 sm:$0xff]  ;;  %s334_s14 = int_to_ptr.vmem [resolvable:$true] %s333_s14 }
  0x1c   :  { %150 = vmatpush.bf16.msra.mxu0 %v477_v6 }
  0x1d   :  { %233 = vmatpush.bf16.msra.mxu1 %v485_v7  ;;  %315 = vmatpush.bf16.msra.mxu2 %v494_v19 }
  0x20   :  { %151 = vmatpush.bf16.msra.mxu0 %v476_v8 }
  0x21   :  { %234 = vmatpush.bf16.msra.mxu1 %v484_v9  ;;  %316 = vmatpush.bf16.msra.mxu2 %v493_v20 }
  0x24   :  { %152 = vmatpush.bf16.msra.mxu0 %v475_v10 }
  0x25   :  { %235 = vmatpush.bf16.msra.mxu1 %v483_v11  ;;  %317 = vmatpush.bf16.msra.mxu2 %v492_v21 }
  0x28   :  { %153 = vmatpush.bf16.msra.mxu0 %v474_v12 }
  0x29   :  { %236 = vmatpush.bf16.msra.mxu1 %v482_v13  ;;  %318 = vmatpush.bf16.msra.mxu2 %v491_v22 }
  0x2c   :  { %154 = vmatpush.bf16.msra.mxu0 %v473_v14 }
  0x2d   :  { %237 = vmatpush.bf16.msra.mxu1 %v481_v16  ;;  %319 = vmatpush.bf16.msra.mxu2 %v490_v24 }
  0x2f   :  { %155 = vmatmul.bf16.vlgmr.msra.gmra.mxu0 %v78_v15 }
  0x31   :  { %320 = vmatpush.bf16.msra.mxu2 %v489_v29 }
  0xac   :  { %v156_v25 = vpop.f32.mrf.mxu0 }
  0xad   :  { %v157_v26 = vadd.f32 %v505_v23, %v156_v25 }
  0xaf   :  { %v160_v27 = vpack.c.bf16 %v157_v26, %v157_v26 }
  0xb1   :  { %161 = vst [vmem:[#allocation8] sm:$0xf] %v160_v27  ;;  %238 = vmatmul.bf16.vlgmr.msra.gmra.mxu1 %v160_v27 }
  0xb2   :  { %338 = dma.vmem_to_hbm [thread:$0]  %s334_s14, 64, %s336_s13, [#allocation4]  }
  0xb4   :  { %v158_v28 = vpop.f32.mrf.mxu0 }
 0x12e   :  { %v239_v31 = vpop.f32.mrf.mxu1 }
 0x12f   :  { %v240_v32 = vadd.f32 %v506_v30, %v239_v31 }
 0x131   :  { %v243_v33 = vpack.c.bf16 %v240_v32, %v240_v32 }
 0x133   :  { %244 = vst [vmem:[#allocation9] sm:$0xf] %v243_v33  ;;  %321 = vmatmul.bf16.vlgmr.msra.gmra.mxu2 %v243_v33 }
 0x134   :  { %349 = dma.vmem_to_hbm [thread:$0]  %s345_s28, 64, %s347_s10, [#allocation10]  }
 0x136   :  { %v241_v34 = vpop.f32.mrf.mxu1 }
 0x1b6   :  { %v322_v36 = vpop.f32.mrf.mxu2 }
 0x1b7   :  { %v323_v37 = vadd.f32 %v507_v35, %v322_v36 }
 0x1b9   :  { %v326_v38 = vpack.c.bf16 %v323_v37, %v323_v37 }
 0x1bb   :  { %327 = vst [vmem:[#allocation11] sm:$0xf] %v326_v38 }
 0x1bc   :  { %360 = dma.vmem_to_hbm [thread:$0]  %s356_s18, 64, %s358_s20, [#allocation10]  }
 0x1be   :  { %v324_v39 = vpop.f32.mrf.mxu2 }
 0x1bf   :  { %656 = dma.done.wait [#allocation4], 64  }
 0x1c0   :  { %657 = vsyncadd [#allocation4], 4294967232 }
 0x1c1   :  { %658 = dma.done.wait [#allocation10], 128  }
 0x1c2   :  { %659 = vsyncadd [#allocation10], 4294967168 }
 0x1c3   :  { %373 = vsyncpa [#allocation3], 1 }
 0x1c4   :  { %374 = vsyncpa [#allocation6], 1 }
 0x1c5   :  { %375 = vsyncpa [#allocation4], 1 }
 0x1c6   :  { %376 = vsyncpa [#allocation10], 1 }

</bundles_post_ra>
